<compile_context>
chip_gen: v7x
topology: tpu7x:2x2x1
jax: 0.10.0
libtpu: 0.0.40
codegen_flags: <defaults>
</compile_context>

<pallas_src>
import jax
import jax.numpy as jnp
from jax.experimental import pallas as pl
from jax.experimental.pallas import tpu as pltpu


def joint_logsoftmax_kernel(enc_ref, dec_ref, out_ref):
    """enc_ref: (tT, V) = enc @ W_enc
       dec_ref: (tU, V) = dec @ W_dec + bias   (bias folded once per U-row)
       out_ref: (tT, tU, V) log-softmax over the last (lane) axis."""
    enc = enc_ref[...]                                   # (tT, V)
    dec = dec_ref[...]                                   # (tU, V)

    logits = enc[:, None, :] + dec[None, :, :]           # (tT, tU, V)

    # Two-pass log-softmax over the vocab (lane) axis.
    m = jnp.max(logits, axis=-1, keepdims=True)
    shifted = logits - m
    sum_exp = jnp.sum(jnp.exp(shifted), axis=-1, keepdims=True)
    out_ref[...] = (shifted - jnp.log(sum_exp)).astype(out_ref.dtype)


def _pick_tile(n, cap):
    """Largest multiple-of-8 divisor of n that is <= cap (keeps the (8,128)
    sublane rule for the block shapes); fall back to the full extent."""
    for d in range(min(cap, n), 0, -1):
        if n % d == 0 and d % 8 == 0:
            return d
    return n  # full extent is always a legal block size


def _pick_tiles(T, U, V, budget_bytes=2 * 1024 * 1024):
    """Pick (tT, tU) so a single f32 output tile tT*tU*V*4 stays within a
    few-MiB budget (leaves headroom for double-buffering + temporaries on
    v7x's 64 MiB VMEM)."""
    tT = _pick_tile(T, 64)
    tU = _pick_tile(U, 64)
    for cap in (32, 16, 8):
        if tT * tU * V * 4 <= budget_bytes:
            break
        tT = _pick_tile(T, cap)
        tU = _pick_tile(U, cap)
    return tT, tU


def joint_net(encoder_output, decoder_output, weight, bias, *, out_dtype=jnp.float32):
    """weight: (num_vocabs, D_enc + D_dec)   (PyTorch nn.Linear convention)
       bias:   (num_vocabs,)
       Returns (B, T, U, num_vocabs) log-probabilities."""
    B, T, De = encoder_output.shape
    B2, U, Dd = decoder_output.shape
    assert B == B2
    V, Din = weight.shape
    assert Din == De + Dd

    w_enc = weight[:, :De].T            # (D_enc, V)
    w_dec = weight[:, De:].T            # (D_dec, V)

    # Hoisted matmuls (plain XLA); bias folded into the decoder slab so the
    # kernel's hot loop has only a 2-way broadcast add.
    enc_logits = jnp.einsum("btd,dv->btv", encoder_output, w_enc,
                            preferred_element_type=jnp.float32)      # (B, T, V)
    dec_logits = jnp.einsum("bud,dv->buv", decoder_output, w_dec,
                            preferred_element_type=jnp.float32) + bias  # (B, U, V)

    tT, tU = _pick_tiles(T, U, V)
    grid = (B, T // tT, U // tU)

    return pl.pallas_call(
        joint_logsoftmax_kernel,
        out_shape=jax.ShapeDtypeStruct((B, T, U, V), out_dtype),
        grid_spec=pltpu.PrefetchScalarGridSpec(
            num_scalar_prefetch=0,
            grid=grid,
            in_specs=[
                # Batch dim squeezed out of the kernel-visible refs.
                pl.BlockSpec((None, tT, V), lambda b, i, j: (b, i, 0)),
                pl.BlockSpec((None, tU, V), lambda b, i, j: (b, j, 0)),
            ],
            out_specs=pl.BlockSpec((None, tT, tU, V),
                                   lambda b, i, j: (b, i, j, 0)),
        ),
        compiler_params=pltpu.CompilerParams(
            dimension_semantics=("parallel", "parallel", "parallel")),
    )(enc_logits, dec_logits)


def joint_net_ref(encoder_output, decoder_output, weight, bias):
    """Pure-JAX reference mirroring the PyTorch forward."""
    B, T, De = encoder_output.shape
    _, U, Dd = decoder_output.shape
    enc = jnp.broadcast_to(encoder_output[:, :, None, :], (B, T, U, De))
    dec = jnp.broadcast_to(decoder_output[:, None, :, :], (B, T, U, Dd))
    x = jnp.concatenate([enc, dec], axis=-1)           # (B, T, U, De+Dd)
    logits = x @ weight.T + bias                        # (B, T, U, V)
    return jax.nn.log_softmax(logits, axis=-1)


if __name__ == "__main__":
    key = jax.random.PRNGKey(0)
    B, T, U = 2, 8, 8
    D_enc, D_dec = 16, 16
    output_dim = D_enc + D_dec          # joint input dim
    num_vocabs = 128                    # multiple of 128 -> lane-dense stores

    k1, k2, k3, k4 = jax.random.split(key, 4)
    encoder_output = jax.random.normal(k1, (B, T, D_enc), dtype=jnp.float32)
    decoder_output = jax.random.normal(k2, (B, U, D_dec), dtype=jnp.float32)
    # Deterministic nn.Linear-shaped parameters (synthetic init, no checkpoint).
    weight = 0.1 * jax.random.normal(k3, (num_vocabs, output_dim), dtype=jnp.float32)
    bias = 0.1 * jax.random.normal(k4, (num_vocabs,), dtype=jnp.float32)

    out = joint_net(encoder_output, decoder_output, weight, bias)
    out = jax.block_until_ready(out)

    ref = joint_net_ref(encoder_output, decoder_output, weight, bias)
    assert out.shape == (B, T, U, num_vocabs)
    assert jnp.allclose(out, ref, atol=1e-5, rtol=1e-5), \
        f"max abs err {jnp.max(jnp.abs(out - ref))}"

    print("KERNEL_OK")
</pallas_src>

<mosaic_0001>
module attributes {stable_mosaic.version = 11 : i64} {
  func.func @joint_logsoftmax_kernel(%arg0: i32, %arg1: i32, %arg2: i32, %arg3: memref<1x8x128xf32, #tpu.memory_space<vmem>>, %arg4: memref<1x8x128xf32, #tpu.memory_space<vmem>>, %arg5: memref<1x8x8x128xf32, #tpu.memory_space<vmem>>) attributes {dimension_semantics = [#tpu.dimension_semantics<parallel>, #tpu.dimension_semantics<parallel>, #tpu.dimension_semantics<parallel>], iteration_bounds = array<i64: 2, 1, 1>, scalar_prefetch = 0 : i64, scratch_operands = 0 : i64, tpu.core_type = #tpu.core_type<tc>, window_params = [{transform_indices = @transform_0, window_bounds = array<i64: 1, 8, 128>}, {transform_indices = @transform_1, window_bounds = array<i64: 1, 8, 128>}, {transform_indices = @transform_2, window_bounds = array<i64: 1, 8, 8, 128>}]} {
    %c0 = arith.constant 0 : index
    %c0_0 = arith.constant 0 : index
    %c0_1 = arith.constant 0 : index
    %0 = vector.load %arg3[%c0, %c0_0, %c0_1] : memref<1x8x128xf32, #tpu.memory_space<vmem>>, vector<1x8x128xf32>
    %1 = vector.shape_cast %0 : vector<1x8x128xf32> to vector<8x128xf32>
    %c0_2 = arith.constant 0 : index
    %c0_3 = arith.constant 0 : index
    %c0_4 = arith.constant 0 : index
    %2 = vector.load %arg4[%c0_2, %c0_3, %c0_4] : memref<1x8x128xf32, #tpu.memory_space<vmem>>, vector<1x8x128xf32>
    %3 = vector.shape_cast %2 : vector<1x8x128xf32> to vector<8x128xf32>
    %4 = vector.shape_cast %1 : vector<8x128xf32> to vector<8x1x128xf32>
    %5 = vector.shape_cast %3 : vector<8x128xf32> to vector<1x8x128xf32>
    %6 = vector.broadcast %4 : vector<8x1x128xf32> to vector<8x8x128xf32>
    %7 = vector.broadcast %5 : vector<1x8x128xf32> to vector<8x8x128xf32>
    %8 = arith.addf %6, %7 : vector<8x8x128xf32>
    %cst = arith.constant dense<0xFF800000> : vector<8x8xf32>
    %9 = vector.multi_reduction <maximumf>, %8, %cst [2] : vector<8x8x128xf32> to vector<8x8xf32>
    %10 = vector.shape_cast %9 : vector<8x8xf32> to vector<8x8x1xf32>
    %11 = vector.broadcast %10 : vector<8x8x1xf32> to vector<8x8x128xf32>
    %12 = arith.subf %8, %11 : vector<8x8x128xf32>
    %13 = math.exp %12 : vector<8x8x128xf32>
    %cst_5 = arith.constant dense<0.000000e+00> : vector<8x8xf32>
    %14 = vector.multi_reduction <add>, %13, %cst_5 [2] : vector<8x8x128xf32> to vector<8x8xf32>
    %15 = vector.shape_cast %14 : vector<8x8xf32> to vector<8x8x1xf32>
    %16 = math.log %15 : vector<8x8x1xf32>
    %17 = vector.broadcast %16 : vector<8x8x1xf32> to vector<8x8x128xf32>
    %18 = arith.subf %12, %17 : vector<8x8x128xf32>
    %c0_6 = arith.constant 0 : index
    %c0_7 = arith.constant 0 : index
    %c0_8 = arith.constant 0 : index
    %c0_9 = arith.constant 0 : index
    %19 = vector.load %arg5[%c0_6, %c0_7, %c0_8, %c0_9] : memref<1x8x8x128xf32, #tpu.memory_space<vmem>>, vector<1x8x8x128xf32>
    %20 = vector.shape_cast %19 : vector<1x8x8x128xf32> to vector<8x8x128xf32>
    %21 = vector.shape_cast %18 : vector<8x8x128xf32> to vector<1x8x8x128xf32>
    tpu.vector_store %arg5[%c0_6, %c0_7, %c0_8, %c0_9], %21 {strides = array<i32>} : memref<1x8x8x128xf32, #tpu.memory_space<vmem>>, vector<1x8x8x128xf32>,
    return
  }
  func.func @transform_0(%arg0: i32, %arg1: i32, %arg2: i32) -> (i32, i32, i32) {
    %c0_i32 = arith.constant 0 : i32
    %c0_i32_0 = arith.constant 0 : i32
    return %arg0, %arg1, %c0_i32 : i32, i32, i32
  }
  func.func @transform_1(%arg0: i32, %arg1: i32, %arg2: i32) -> (i32, i32, i32) {
    %c0_i32 = arith.constant 0 : i32
    %c0_i32_0 = arith.constant 0 : i32
    return %arg0, %arg2, %c0_i32 : i32, i32, i32
  }
  func.func @transform_2(%arg0: i32, %arg1: i32, %arg2: i32) -> (i32, i32, i32, i32) {
    %c0_i32 = arith.constant 0 : i32
    %c0_i32_0 = arith.constant 0 : i32
    return %arg0, %arg1, %arg2, %c0_i32 : i32, i32, i32, i32
  }
}

</mosaic_0001>

<bundles_post_ra>
// kernel: tpu_custom_call.1
= control target key start
LH: loop header
LB: loop body
LE: loop exit
PB: predicated region body
PF: predicated region fallthrough
CT: control target
= control target key end

     0   :  { %7 = vsyncpa [#allocation3], 0  ;;  %s1100_s0 = inlined_call_operand.hbm [shape: f32[2,8,128], index: 0, kind: input, shape index: {}]   ;;  %s1101_s1 = inlined_call_operand.hbm [shape: f32[2,8,128], index: 1, kind: input, shape index: {}]   ;;  %s1102_s2 = inlined_call_operand.hbm [shape: f32[2,8,8,128], index: 2, kind: output, shape index: {}]  }
   0x1   :  { %9 = vsyncpa [#allocation3 + $0x1], 0 }
   0x2   :  { %10 = vsyncpa [#allocation6], 0 }
   0x3   :  { %12 = vsyncpa [#allocation6 + $0x1], 0 }
   0x4   :  { %13 = vsyncpa [#allocation4], 0 }
   0x5   :  { %15 = vsyncpa [#allocation4 + $0x1], 0  ;;  %s834_s9 = smov 0   ;;  %s836_s10 = smov 0  }
   0x6   :  { %s838_s11 = smov 0   ;;  %s840_s12 = smov 0  }
   0x7   :  { %s842_s13 = smov 0   ;;  %s844_s14 = smov 0  }
   0x8 LB: > { %s544_s15 = sadd.s32 4294967295, %s811_s14   ;;  %s545_s16 = sadd.s32 4294967294, %s811_s14   ;;  %s811_s14 = sphi %s844_s14, %s21_s14   ;;  %s807_s13 = sphi %s842_s13, %s1122_s13   ;;  %s803_s12 = sphi %s840_s12, %s1121_s12   ;;  %s799_s11 = sphi %s838_s11, %s1120_s11   ;;  %s795_s10 = sphi %s836_s10, %s1119_s10   ;;  %s791_s9 = sphi %s834_s9, %s1118_s9  }
   0x9   : > { %s40_s17 = sadd.s32 1, %s807_s13  ;;  %s49_s18 = sadd.s32 1, %s799_s11 }
   0xa   : > { %p42_p0 = scmp.ge.s32.totalorder %s40_s17, 2  ;;  %p56_p1 = scmp.ne.s32.totalorder %s799_s11, %s795_s10 }
   0xb   : > { %p57_p2 = scmp.eq.s32.totalorder %s811_s14, 0  ;;  %p62_p3 = scmp.ne.s32.totalorder %s795_s10, %s791_s9 }
   0xc   : > { %s1124_s17 = smov (%p42_p0, %s40_s17), 0  ;;  %p63_p5 = scmp.eq.s32.totalorder %s544_s15, 0 }
   0xd   : > { %p875_p4 = por %p57_p2, %p56_p1  ;;  %s44_s20 = ssub.s32 %s807_s13, %s1124_s17 }
   0xe   : > { %p118_p6 = scmp.eq.s32.totalorder %s544_s15, 1  ;;  %p47_p7 = scmp.eq.s32.totalorder %s44_s20, 0 }
   0xf   : > { %p881_p8 = por %p63_p5, %p62_p3  ;;  %p124_p10 = scmp.eq.s32.totalorder %s545_s16, 1 }
  0x10   : > { %p885_p9 = por %p118_p6, %p56_p1  ;;  %p579_p13 = scmp.lt.s32.totalorder %s811_s14, 2 }
  0x11   : > { %s1106_s21 = scalar_select %p881_p8, 1, 0 }
  0x12   : > { %s1107_s22 = scalar_select %p885_p9, 1, 0 }
  0x13   : > { %s890_s23 = scalar_select %p47_p7, %s799_s11, %s49_s18  }
  0x14   : > { %p892_p11 = por %p124_p10, %p62_p3  ;;  %s899_s25 = sand.u32 1, %s799_s11  }
  0x15   : > { %s548_s26 = sshll.u32 %s899_s25, 3  ;;  %s549_s27 = sshll.u32 %s807_s13, 7 }
  0x16   : > { %s1108_s24 = scalar_select %p892_p11, 1, 0 }
  0x17   : > { %s908_s30 = scalar_lea.hbm %s1100_s0, %s549_s27  ;;  %s148_s3 = scalar_lea.vmem [#allocation2], %s548_s26 }
  0x18   : > { %s156_s4 = sshll.u32 %s148_s3, 4  ;;  %p916_p0 = pnand %p579_p13, %p875_p4  ;;  %s912_s4 = int_to_ptr.vmem [resolvable:$true] %s156_s4 }
  0x19   : > { %s145_s6 = scalar_lea.sflag [#allocation3], %s899_s25  ;;  %s665_s7 = scalar_lea.hbm %s908_s30, 128 }
  0x1a   : > { %p666_p3 = scmp.ne.s32.totalorder %s908_s30, %s665_s7  ;;  %p667_p5 = pneg %p916_p0 }
  0x1b   : > { %s670_s16 = scalar_lea.hbm %s1100_s0, 256  ;;  %p671_p4 = scmp.lt.u32.totalorder %s908_s30, %s1100_s0 }
  0x1c   : > { %p668_p6 = pnand %p667_p5, %p666_p3  ;;  %p672_p10 = scmp.lt.u32.totalorder %s670_s16, %s665_s7 }
  0x1d   : > { %p674_p12 = scmp.lt.u32.totalorder %s665_s7, %s908_s30 }
  0x1e   : > { %p669_p7 = pneg %p668_p6  ;;  %p673_p13 = por %p672_p10, %p671_p4 }
  0x20   : > { %p675_p1 = por %p674_p12, %p673_p13 }
  0x22   : > { %p676_p2 = pnand %p675_p1, %p669_p7 }
  0x24   : > { %679 = shalt.err (!%p676_p2)
}
  0x25   : > { %s680_s20 = scalar_lea.vmem %s912_s4, 128  ;;  %s813_s28 = smov [#allocation2]  }
  0x26   : > { %p681_p3 = scmp.ne.s32.totalorder %s912_s4, %s680_s20  ;;  %s685_s29 = sshll.u32 %s813_s28, 4  ;;  %s686_s29 = int_to_ptr.vmem [resolvable:$false] %s685_s29 }
  0x27   : > { %s687_s3 = scalar_lea.vmem %s686_s29, 256  ;;  %p688_p9 = scmp.lt.s32.totalorder %s912_s4, %s686_s29 }
  0x28   : > { %p683_p6 = pnand %p681_p3, %p667_p5  ;;  %p689_p4 = scmp.lt.s32.totalorder %s687_s3, %s680_s20 }
  0x2a   : > { %p684_p11 = pneg %p683_p6  ;;  %p690_p10 = por %p689_p4, %p688_p9 }
  0x2c   : > { %p691_p12 = pnand %p690_p10, %p684_p11 }
  0x2e   : > { %694 = shalt.err (!%p691_p12)
}
  0x2f   : > { %571 = dma.hbm_to_vmem [thread:$0]  (!%p916_p0), %s908_s30, 128, %s912_s4, %s145_s6  }
  0x30   : > { %p1110_p1 = scmp.lt.s32.totalorder %s811_s14, 3  ;;  %p1111_p2 = scmp.ge.s32.totalorder %s811_s14, 1 }
  0x31   : > { %s961_s16 = scalar_lea.hbm %s1101_s1, %s549_s27  ;;  %s167_s18 = scalar_lea.vmem [#allocation5], %s548_s26 }
  0x32   : > { %p952_p7 = pnand %p1111_p2, %p1110_p1  ;;  %s175_s19 = sshll.u32 %s167_s18, 4  ;;  %s176_s19 = int_to_ptr.vmem [resolvable:$true] %s175_s19 }
  0x33   : > { %s164_s30 = scalar_lea.sflag [#allocation6], %s899_s25  ;;  %s695_s4 = scalar_lea.hbm %s961_s16, 128 }
  0x34   : > { %s1112_s7 = scalar_select %p952_p7, 1, 0 }
  0x35   : > { %p696_p9 = scmp.ne.s32.totalorder %s961_s16, %s695_s4  ;;  %s700_s27 = scalar_lea.hbm %s1101_s1, 256 }
  0x36   : > { %p701_p3 = scmp.lt.u32.totalorder %s961_s16, %s1101_s1  ;;  %p702_p6 = scmp.lt.u32.totalorder %s700_s27, %s695_s4 }
  0x37   : > { %p698_p11 = pnand %p696_p9, %p667_p5  ;;  %p704_p10 = scmp.lt.u32.totalorder %s695_s4, %s961_s16 }
  0x38   : > { %p703_p4 = por %p702_p6, %p701_p3 }
  0x39   : > { %p699_p13 = pneg %p698_p11 }
  0x3a   : > { %p705_p12 = por %p704_p10, %p703_p4 }
  0x3c   : > { %p706_p1 = pnand %p705_p12, %p699_p13 }
  0x3e   : > { %709 = shalt.err (!%p706_p1)
}
  0x3f   : > { %s710_s25 = scalar_lea.vmem %s176_s19, 128  ;;  %s814_s26 = smov [#allocation5]  }
  0x40   : > { %p711_p2 = scmp.ne.s32.totalorder %s176_s19, %s710_s25  ;;  %s715_s3 = sshll.u32 %s814_s26, 4  ;;  %s716_s3 = int_to_ptr.vmem [resolvable:$false] %s715_s3 }
  0x41   : > { %s717_s8 = scalar_lea.vmem %s716_s3, 256  ;;  %p718_p8 = scmp.lt.s32.totalorder %s176_s19, %s716_s3 }
  0x42   : > { %p713_p9 = pnand %p711_p2, %p667_p5  ;;  %p719_p7 = scmp.lt.s32.totalorder %s717_s8, %s710_s25 }
  0x44   : > { %p714_p11 = pneg %p713_p9  ;;  %p720_p3 = por %p719_p7, %p718_p8 }
  0x46   : > { %p721_p6 = pnand %p720_p3, %p714_p11 }
  0x48   : > { %724 = shalt.err (!%p721_p6)
}
  0x49   : > { %574 = dma.hbm_to_vmem [thread:$0]  (!%p916_p0), %s961_s16, 128, %s176_s19, %s164_s30  }
  0x4a   : > { %p1113_p13 = scmp.ne.s32.totalorder %s1112_s7, 0 }
  0x4b   : > { %s988_s15 = sand.u32 (!%p1113_p13), 1, %s795_s10   ;;  %p1114_p5 = scmp.ne.s32.totalorder (!%p1113_p13), %s1106_s21, 0 }
  0x4c   : > { %184 = sbr.rel (%p1113_p13) target bundleno = 446 (0x1be), region = 28  ;;  %s553_s18 = sshll.u32 (!%p1113_p13), %s988_s15, 3 }
  0x4d   : > { %s187_s4 = scalar_lea.sflag (!%p1113_p13), [#allocation3], %s988_s15  ;;  %s190_s6 = scalar_lea.vmem (!%p1113_p13), [#allocation2], %s553_s18 }
  0x53   : > { %778 = dma.done.wait (%p1114_p5), %s187_s4, 128  }
  0x54   : > { %780 = vsyncadd (%p1114_p5), %s187_s4, 4294967168  ;;  %s196_s5 = scalar_lea.sflag [#allocation6], %s988_s15  ;;  %s199_s16 = scalar_lea.vmem [#allocation5], %s553_s18 }
  0x55   : > { %782 = dma.done.wait (%p1114_p5), %s196_s5, 128  }
  0x56   : > { %784 = vsyncadd (%p1114_p5), %s196_s5, 4294967168  ;;  %v233_v0 = vlaneseq  ;;  %v815_v1 = vmov 1966171168   ;;  %v226_v6 = vld [vmem:[%s190_s6] sm:$0xff]  ;;  %v227_v13 = vld [vmem:[%s199_s16] sm:$0xff]  ;;  %s555_s21 = sshll.u32 %s988_s15, 6 }
  0x57   : > { %v231_v2 = vunpack.c.l.s4 %v815_v1  ;;  %v229_v9 = vcombine.high %v226_v6, %v226_v6  ;;  %s1027_s7 = scalar_lea.vmem [#allocation7], %s555_s21  ;;  %s561_s19 = sshll.u32 %s803_s12, 10 }
  0x58   : > { %v234_v3 = vshrl.u32 %v233_v0, 7  ;;  %s431_s30 = sshll.u32 %s1027_s7, 4  ;;  %s1047_s28 = scalar_lea.hbm %s1102_s2, %s561_s19  ;;  %s1049_s30 = int_to_ptr.vmem [resolvable:$true] %s431_s30 }
  0x59   : > { %v232_v4 = vunpack.c.0.s8 %v231_v2  ;;  %s415_s12 = scalar_lea.sflag [#allocation4], %s988_s15  ;;  %s725_s29 = scalar_lea.vmem %s1049_s30, 1024 }
  0x5a   : > { %v280_v8 = vsub.s32 0, %v234_v3  ;;  %p726_p8 = scmp.ne.s32.totalorder %s1049_s30, %s725_s29  ;;  %p1115_p0 = scmp.ne.s32.totalorder %s1107_s22, 0 }
  0x5b   : > { %v235_v5 = vsub.s32 %v232_v4, %v234_v3  ;;  %s816_s25 = smov [#allocation7]  }
  0x5c   : > { %p727_p7 = pnand %p726_p8, %p1115_p0  ;;  %s729_s26 = sshll.u32 %s816_s25, 4  ;;  %s730_s26 = int_to_ptr.vmem [resolvable:$false] %s729_s26 }
  0x5d   : > { %v236_v7 = vrot.slane %v226_v6, %v235_v5  ;;  %v243_v12 = vrot.slane %v229_v9, %v235_v5  ;;  %s731_s3 = scalar_lea.vmem %s730_s26, 2048  ;;  %p732_p10 = scmp.lt.s32.totalorder %s1049_s30, %s730_s26 }
  0x5e   : > { %p728_p4 = pneg %p727_p7  ;;  %p733_p12 = scmp.lt.s32.totalorder %s731_s3, %s725_s29 }
  0x5f   : > { %v252_v10 = vrot.slane %v236_v7, %v235_v5  ;;  %v244_v11 = vcombine.high %v236_v7, %v236_v7  ;;  %v259_v17 = vrot.slane %v243_v12, %v235_v5  ;;  %v245_v18 = vcombine.high %v243_v12, %v243_v12 }
  0x60   : > { %p734_p1 = por %p733_p12, %p732_p10 }
  0x61   : > { %v281_v14 = vrot.slane %v252_v10, %v280_v8  ;;  %v274_v15 = vcombine.high %v252_v10, %v252_v10  ;;  %v266_v16 = vrot.slane %v244_v11, %v235_v5  ;;  %v297_v23 = vrot.slane %v259_v17, %v280_v8 }
  0x62   : > { %v273_v24 = vrot.slane %v245_v18, %v235_v5  ;;  %v275_v28 = vcombine.high %v259_v17, %v259_v17  ;;  %p735_p2 = pnand %p734_p1, %p728_p4 }
  0x63   : > { %v318_v19 = vadd.f32 %v281_v14, %v227_v13  ;;  %v289_v20 = vrot.slane %v274_v15, %v280_v8  ;;  %v285_v21 = vrot.slane %v266_v16, %v280_v8  ;;  %v276_v22 = vcombine.high %v266_v16, %v266_v16 }
  0x64   : > { %v301_v30 = vrot.slane %v273_v24, %v280_v8  ;;  %v277_v31 = vcombine.high %v273_v24, %v273_v24  ;;  %v322_v32 = vadd.f32 %v297_v23, %v227_v13  ;;  %v305_v33 = vrot.slane %v275_v28, %v280_v8 }
  0x65   : > { %326 = vmax.xlane.f32.xlu0 %v318_v19  ;;  %v320_v25 = vadd.f32 %v289_v20, %v227_v13  ;;  %v319_v26 = vadd.f32 %v285_v21, %v227_v13  ;;  %v293_v27 = vrot.slane %v276_v22, %v280_v8 }
  0x66   : > { %v323_v34 = vadd.f32 %v301_v30, %v227_v13  ;;  %v309_v35 = vrot.slane %v277_v31, %v280_v8  ;;  %v324_v36 = vadd.f32 %v305_v33, %v227_v13 }
  0x67   : > { %330 = vmax.xlane.f32.xlu1 %v320_v25  ;;  %v321_v29 = vadd.f32 %v293_v27, %v227_v13 }
  0x68   : > { %v325_v37 = vadd.f32 %v309_v35, %v227_v13 }
  0x69   : > { %328 = vmax.xlane.f32.xlu0 %v319_v26 }
  0x6b   : > { %332 = vmax.xlane.f32.xlu1 %v321_v29 }
  0x6d   : > { %334 = vmax.xlane.f32.xlu0 %v322_v32 }
  0x6f   : > { %336 = vmax.xlane.f32.xlu1 %v323_v34 }
  0x71   : > { %338 = vmax.xlane.f32.xlu0 %v324_v36 }
  0x73   : > { %340 = vmax.xlane.f32.xlu1 %v325_v37 }
  0xf2   : > { %v327_v38 = vpop.xlane.xlu0 %326 }
  0xf3   : > { %v1001_v39 = vsub.f32 %v318_v19, %v327_v38 }
  0xf4   : > { %v331_v40 = vpop.xlane.xlu1 %330 }
  0xf5   : > { %v350_v41 = vmul.f32 1.442695, %v1001_v39  ;;  %v1004_v42 = vsub.f32 %v320_v25, %v331_v40 }
  0xf6   : > { %v329_v43 = vpop.xlane.xlu0 %328 }
  0xf7   : > { %633 = vpow2.f32 %v350_v41  ;;  %v354_v44 = vmul.f32 1.442695, %v1004_v42  ;;  %v1007_v45 = vsub.f32 %v319_v26, %v329_v43 }
  0xf8   : > { %v333_v46 = vpop.xlane.xlu1 %332 }
  0xf9   : > { %635 = vpow2.f32 %v354_v44  ;;  %v352_v47 = vmul.f32 1.442695, %v1007_v45  ;;  %v1010_v48 = vsub.f32 %v321_v29, %v333_v46 }
  0xfa   : > { %v335_v49 = vpop.xlane.xlu0 %334 }
  0xfb   : > { %637 = vpow2.f32 %v352_v47  ;;  %v356_v50 = vmul.f32 1.442695, %v1010_v48  ;;  %v1013_v51 = vsub.f32 %v322_v32, %v335_v49 }
  0xfc   : > { %v337_v52 = vpop.xlane.xlu1 %336 }
  0xfd   : > { %639 = vpow2.f32 %v356_v50  ;;  %v358_v53 = vmul.f32 1.442695, %v1013_v51  ;;  %v1016_v54 = vsub.f32 %v323_v34, %v337_v52 }
  0xfe   : > { %v339_v55 = vpop.xlane.xlu0 %338 }
  0xff   : > { %641 = vpow2.f32 %v358_v53  ;;  %v1018_v56 = vsub.f32 %v324_v36, %v339_v55  ;;  %v360_v57 = vmul.f32 1.442695, %v1016_v54 }
 0x100   : > { %v341_v58 = vpop.xlane.xlu1 %340 }
 0x101   : > { %v634_v59 = vpop.eup %633  ;;  %v362_v60 = vmul.f32 1.442695, %v1018_v56  ;;  %643 = vpow2.f32 %v360_v57  ;;  %v1022_v61 = vsub.f32 %v325_v37, %v341_v58 }
 0x102   : > { %366 = vadd.xlane.f32.xlu0 %v634_v59 }
 0x103   : > { %v636_v62 = vpop.eup %635  ;;  %645 = vpow2.f32 %v362_v60  ;;  %v364_v63 = vmul.f32 1.442695, %v1022_v61 }
 0x105   : > { %v638_v0 = vpop.eup %637  ;;  %647 = vpow2.f32 %v364_v63 }
 0x106   : > { %370 = vadd.xlane.f32.xlu0 %v636_v62  ;;  %368 = vadd.xlane.f32.xlu1 %v638_v0 }
 0x107   : > { %v640_v1 = vpop.eup %639 }
 0x109   : > { %v642_v2 = vpop.eup %641 }
 0x10a   : > { %374 = vadd.xlane.f32.xlu0 %v642_v2  ;;  %372 = vadd.xlane.f32.xlu1 %v640_v1 }
 0x10b   : > { %v644_v3 = vpop.eup %643 }
 0x10d   : > { %v646_v4 = vpop.eup %645 }
 0x10e   : > { %378 = vadd.xlane.f32.xlu0 %v646_v4  ;;  %376 = vadd.xlane.f32.xlu1 %v644_v3 }
 0x10f   : > { %v648_v5 = vpop.eup %647 }
 0x112   : > { %380 = vadd.xlane.f32.xlu1 %v648_v5 }
 0x18f   : > { %v367_v6 = vpop.xlane.xlu0 %366 }
 0x190   : > { %649 = vlog2.f32 %v367_v6 }
 0x193   : > { %v371_v7 = vpop.xlane.xlu0 %370  ;;  %v369_v8 = vpop.xlane.xlu1 %368 }
 0x194   : > { %651 = vlog2.f32 %v371_v7 }
 0x195   : > { %653 = vlog2.f32 %v369_v8 }
 0x197   : > { %v375_v9 = vpop.xlane.xlu0 %374  ;;  %v373_v10 = vpop.xlane.xlu1 %372 }
 0x198   : > { %655 = vlog2.f32 %v375_v9 }
 0x199   : > { %657 = vlog2.f32 %v373_v10 }
 0x19a   : > { %v650_v11 = vpop.eup %649 }
 0x19b   : > { %v383_v12 = vmul.f32 0.6931472, %v650_v11  ;;  %v379_v13 = vpop.xlane.xlu0 %378  ;;  %v377_v14 = vpop.xlane.xlu1 %376 }
 0x19c   : > { %659 = vlog2.f32 %v379_v13 }
 0x19d   : > { %v398_v15 = vsub.f32 %v1001_v39, %v383_v12  ;;  %661 = vlog2.f32 %v377_v14 }
 0x19e   : > { %v652_v16 = vpop.eup %651 }
 0x19f   : > { %v654_v17 = vpop.eup %653  ;;  %406 = vst [vmem:[%s1027_s7] sm:$0xff] %v398_v15  ;;  %v387_v18 = vmul.f32 0.6931472, %v652_v16  ;;  %v381_v19 = vpop.xlane.xlu1 %380 }
 0x1a0   : > { %v385_v20 = vmul.f32 0.6931472, %v654_v17  ;;  %663 = vlog2.f32 %v381_v19 }
 0x1a1   : > { %v400_v21 = vsub.f32 %v1004_v42, %v387_v18 }
 0x1a2   : > { %v656_v22 = vpop.eup %655  ;;  %v399_v23 = vsub.f32 %v1007_v45, %v385_v20 }
 0x1a3   : > { %v658_v24 = vpop.eup %657  ;;  %408 = vst [vmem:[%s1027_s7 + $0x10] sm:$0xff] %v400_v21  ;;  %v391_v25 = vmul.f32 0.6931472, %v656_v22 }
 0x1a4   : > { %407 = vst [vmem:[%s1027_s7 + $0x8] sm:$0xff] %v399_v23  ;;  %v389_v26 = vmul.f32 0.6931472, %v658_v24 }
 0x1a5   : > { %v402_v27 = vsub.f32 %v1013_v51, %v391_v25 }
 0x1a6   : > { %v660_v28 = vpop.eup %659  ;;  %v401_v29 = vsub.f32 %v1010_v48, %v389_v26 }
 0x1a7   : > { %v662_v30 = vpop.eup %661  ;;  %410 = vst [vmem:[%s1027_s7 + $0x20] sm:$0xff] %v402_v27  ;;  %v395_v31 = vmul.f32 0.6931472, %v660_v28 }
 0x1a8   : > { %409 = vst [vmem:[%s1027_s7 + $0x18] sm:$0xff] %v401_v29  ;;  %v393_v32 = vmul.f32 0.6931472, %v662_v30 }
 0x1a9   : > { %v404_v33 = vsub.f32 %v1018_v56, %v395_v31 }
 0x1aa   : > { %v664_v34 = vpop.eup %663  ;;  %v403_v35 = vsub.f32 %v1016_v54, %v393_v32 }
 0x1ab   : > { %412 = vst [vmem:[%s1027_s7 + $0x30] sm:$0xff] %v404_v33  ;;  %v397_v36 = vmul.f32 0.6931472, %v664_v34 }
 0x1ac   : > { %411 = vst [vmem:[%s1027_s7 + $0x28] sm:$0xff] %v403_v35 }
 0x1ad   : > { %v405_v37 = vsub.f32 %v1022_v61, %v397_v36 }
 0x1af   : > { %413 = vst [vmem:[%s1027_s7 + $0x38] sm:$0xff] %v405_v37 }
 0x1b0   : > { %738 = shalt.err (!%p735_p2)
}
 0x1b1   : > { %s739_s8 = scalar_lea.hbm %s1047_s28, 1024  ;;  %s743_s6 = scalar_lea.hbm %s1102_s2, 2048 }
 0x1b2   : > { %p740_p9 = scmp.ne.s32.totalorder %s1047_s28, %s739_s8  ;;  %p744_p6 = scmp.lt.u32.totalorder %s1047_s28, %s1102_s2 }
 0x1b3   : > { %p745_p13 = scmp.lt.u32.totalorder %s743_s6, %s739_s8  ;;  %p747_p8 = scmp.lt.u32.totalorder %s739_s8, %s1047_s28 }
 0x1b4   : > { %p741_p11 = pnand %p740_p9, %p1115_p0 }
 0x1b5   : > { %p746_p5 = por %p745_p13, %p744_p6 }
 0x1b6   : > { %p742_p3 = pneg %p741_p11 }
 0x1b7   : > { %p748_p7 = por %p747_p8, %p746_p5 }
 0x1b9   : > { %p749_p4 = pnand %p748_p7, %p742_p3 }
 0x1bb   : > { %752 = shalt.err (!%p749_p4)
}
 0x1bc   : > { %s817_s21 = smov 128   ;;  %s818_s7 = smov 8  }
 0x1bd   : > { %566 = dma.vmem_to_hbm [thread:$0]  (%p1115_p0), %s1049_s30, 1024, %s1047_s28, %s415_s12, %s817_s21, %s817_s21, %s818_s7  }
 0x1be PF: > { %s446_s19 = sand.u32 1, %s791_s9   ;;  %p1116_p10 = scmp.ne.s32.totalorder %s1108_s24, 0 }
 0x1bf   : > { %p1117_p12 = scmp.ge.s32.totalorder %s811_s14, 2  ;;  %s447_s20 = scalar_lea.sflag [#allocation4], %s446_s19 }
 0x1c1   : > { %p576_p1 = pnand %p1117_p12, %p1116_p10 }
 0x1c3   : > { %786 = dma.done.wait (!%p576_p1), %s447_s20, 1024  }
 0x1c4   : > { %788 = vsyncadd (!%p576_p1), %s447_s20, 4294966272  ;;  %s21_s14 = sadd.s32 1, %s811_s14   ;;  %s1118_s9 = smov %s795_s10 }
 0x1c5   : > { %p18_p2 = scmp.ge.s32.totalorder %s21_s14, 4   ;;  %s1119_s10 = smov %s799_s11 }
 0x1c6   : > { %s1120_s11 = smov %s890_s23  ;;  %s1121_s12 = smov %s807_s13 }
 0x1c7   : > { %s1122_s13 = smov %s1124_s17  ;;  %20 = sbr.rel (!%p18_p2) target bundleno = 8 (0x8), region = 86 }
 0x1ce   :  { %452 = vsyncpa [#allocation3], 1 }
 0x1cf   :  { %454 = vsyncpa [#allocation3 + $0x1], 1 }
 0x1d0   :  { %455 = vsyncpa [#allocation6], 1 }
 0x1d1   :  { %457 = vsyncpa [#allocation6 + $0x1], 1 }
 0x1d2   :  { %458 = vsyncpa [#allocation4], 1 }
 0x1d3   :  { %460 = vsyncpa [#allocation4 + $0x1], 1 }

</bundles_post_ra>
